<compile_context>
chip_gen: v6e
topology: v6e:2x2x1
jax: 0.10.0
libtpu: 0.0.40
codegen_flags: <defaults>
</compile_context>

<pallas_src>
import jax
import jax.numpy as jnp
from jax.experimental import pallas as pl
from jax.experimental.pallas import tpu as pltpu


def _bofucb_forward_kernel(h_ref, w_ref, bias_ref, out_ref):
    D = h_ref.shape[1]
    hf = h_ref[...].astype(jnp.float32)                                # (tm, D) f32

    # One MXU matmul against the extended RHS [Sig | weight_mu] -> (tm, D+1).
    hsm = jnp.dot(hf, w_ref[...], preferred_element_type=jnp.float32)
    hs = hsm[:, :D]                                                    # h @ Sig       (tm, D)
    mu = hsm[:, D:D + 1]                                               # h @ weight_mu (tm, 1)

    # Variance row-sum on the MXU instead of a cross-lane (XLU) reduce:
    # var = (hs * h) @ ones((D, 1)).
    p = hs * hf                                                        # (tm, D) VPU
    ones_col = jnp.ones((D, 1), jnp.float32)
    var = jnp.dot(p, ones_col, preferred_element_type=jnp.float32)     # (tm, 1)

    # Clamp before sqrt: NaN guard for garbage rows of the partial last block
    # (their stores are masked by Pallas anyway).
    std = jnp.sqrt(jnp.maximum(var, 0.0))

    # Packed (tm, 2) = [mu + bias, std]: single store / single writeback per step.
    out_ref[...] = jnp.concatenate([mu + bias_ref[0], std], axis=1)


def _round_up(x, m):
    return (x + m - 1) // m * m


def _round_down(x, m):
    return (x // m) * m


def _choose_tm(N, D, itemsize, *, target_tile_bytes=2 << 20, tm_cap=8192, min_steps=8):
    """Row tile: ~target_tile_bytes of h per step, multiple of 8, and small enough
    that the grid keeps >= min_steps steps when N allows (v7x 2-TC sharding)."""
    tm = _round_down(max(target_tile_bytes // max(D * itemsize, 1), 8), 8)
    tm = max(8, min(tm, tm_cap))
    steps_cap = _round_up(pl.cdiv(N, min_steps), 8)
    tm = min(tm, max(steps_cap, 8))
    tm = min(tm, _round_up(N, 8))
    return max(tm, 8)


def bofucb_forward(h, weight_Sig, weight_mu, bias_mu, *,
                   target_tile_bytes=2 << 20, tm_cap=8192, min_steps=8):
    """Returns (ypred_mu, ypred_std), both (N, 1) float32."""
    N, D = h.shape
    itemsize = jnp.dtype(h.dtype).itemsize

    tm = _choose_tm(N, D, itemsize, target_tile_bytes=target_tile_bytes,
                    tm_cap=tm_cap, min_steps=min_steps)
    grid = pl.cdiv(N, tm)

    # Extended, resident RHS: [Sig | weight_mu], kept in f32 (no downcast of the
    # covariance even when h is bf16).
    w_ext = jnp.concatenate(
        [weight_Sig.astype(jnp.float32),
         weight_mu.reshape(D, 1).astype(jnp.float32)], axis=1)         # (D, D+1)
    bias = bias_mu.reshape(1).astype(jnp.float32)                      # SMEM scalar

    # VMEM budget from actual usage (h / out double-buffered, resident weights
    # default double-buffered) plus generous headroom; capped for v7x (64 MiB).
    vmem_needed = 2 * tm * D * itemsize + 2 * tm * 2 * 4 + 2 * D * (D + 1) * 4
    vmem_limit = int(min(max(vmem_needed + (8 << 20), 16 << 20), 48 << 20))

    out = pl.pallas_call(
        _bofucb_forward_kernel,
        out_shape=jax.ShapeDtypeStruct((N, 2), jnp.float32),
        grid_spec=pltpu.PrefetchScalarGridSpec(
            num_scalar_prefetch=0,
            grid=(grid,),
            in_specs=[
                pl.BlockSpec((tm, D), lambda i: (i, 0)),               # h: streamed rows
                pl.BlockSpec((D, D + 1), lambda i: (0, 0)),            # [Sig|mu]: resident
                pl.BlockSpec(memory_space=pltpu.MemorySpace.SMEM),     # bias_mu scalar
            ],
            out_specs=pl.BlockSpec((tm, 2), lambda i: (i, 0)),         # packed [mu, std]
        ),
        compiler_params=pltpu.CompilerParams(
            dimension_semantics=("parallel",),
            vmem_limit_bytes=vmem_limit,
        ),
    )(h, w_ext, bias)

    return out[:, 0:1], out[:, 1:2]


if __name__ == "__main__":
    key = jax.random.PRNGKey(0)
    k_h, k_a, k_mu, k_b, k_h2 = jax.random.split(key, 5)

    D = 32  # in_features

    # Module __init__ gives weight_Sig = inv(eye(D)/lambda_) = eye(D),
    # weight_mu = zeros(D,1), bias_mu = zeros(1). Same shapes, but deterministic
    # pseudo-random values (SPD Sig) so the kernel path is numerically non-trivial.
    A = 0.1 * jax.random.normal(k_a, (D, D), dtype=jnp.float32)
    weight_Sig = jnp.eye(D, dtype=jnp.float32) + A @ A.T               # (D, D), SPD
    weight_mu = 0.1 * jax.random.normal(k_mu, (D, 1), dtype=jnp.float32)
    bias_mu = 0.1 * jax.random.normal(k_b, (1,), dtype=jnp.float32)

    def ref_forward(h):
        ref_mu = h @ weight_mu + bias_mu
        ref_std = jnp.sqrt(jnp.sum((h @ weight_Sig) * h, axis=1, keepdims=True))
        return ref_mu, ref_std

    # --- test 1: small batch (tiny tile, 2-step grid) ---
    N1 = 16
    h1 = jax.random.normal(k_h, (N1, D), dtype=jnp.float32)
    mu1, std1 = bofucb_forward(h1, weight_Sig, weight_mu, bias_mu)
    jax.block_until_ready((mu1, std1))
    rmu1, rstd1 = ref_forward(h1)
    assert mu1.shape == (N1, 1) and std1.shape == (N1, 1)
    assert jnp.allclose(mu1, rmu1, atol=1e-4, rtol=1e-4)
    assert jnp.allclose(std1, rstd1, atol=1e-4, rtol=1e-4)

    # --- test 2: ragged batch (multi-step parallel grid, partial last block) ---
    N2 = 300
    h2 = jax.random.normal(k_h2, (N2, D), dtype=jnp.float32)
    mu2, std2 = bofucb_forward(h2, weight_Sig, weight_mu, bias_mu)
    jax.block_until_ready((mu2, std2))
    rmu2, rstd2 = ref_forward(h2)
    assert mu2.shape == (N2, 1) and std2.shape == (N2, 1)
    assert jnp.allclose(mu2, rmu2, atol=1e-4, rtol=1e-4)
    assert jnp.allclose(std2, rstd2, atol=1e-4, rtol=1e-4)

    print("KERNEL_OK")
</pallas_src>

<mosaic_0001>
module attributes {stable_mosaic.version = 11 : i64} {
  func.func @_bofucb_forward_kernel(%arg0: i32, %arg1: memref<8x32xf32, #tpu.memory_space<vmem>>, %arg2: memref<32x33xf32, #tpu.memory_space<vmem>>, %arg3: memref<1xf32, #tpu.memory_space<smem>>, %arg4: memref<8x2xf32, #tpu.memory_space<vmem>>) attributes {dimension_semantics = [#tpu.dimension_semantics<parallel>], iteration_bounds = array<i64: 2>, scalar_prefetch = 0 : i64, scratch_operands = 0 : i64, tpu.core_type = #tpu.core_type<tc>, window_params = [{transform_indices = @transform_0, window_bounds = array<i64: 8, 32>}, {pipeline_mode = #tpu.pipeline_mode<synchronous>, transform_indices = @transform_1, window_bounds = array<i64: 32, 33>}, {transform_indices = @transform_2, window_bounds = array<i64: 1>}, {transform_indices = @transform_3, window_bounds = array<i64: 8, 2>}]} {
    %c0 = arith.constant 0 : index
    %c0_0 = arith.constant 0 : index
    %0 = vector.load %arg1[%c0, %c0_0] : memref<8x32xf32, #tpu.memory_space<vmem>>, vector<8x32xf32>
    %c0_1 = arith.constant 0 : index
    %c0_2 = arith.constant 0 : index
    %1 = vector.load %arg2[%c0_1, %c0_2] : memref<32x33xf32, #tpu.memory_space<vmem>>, vector<32x33xf32>
    %cst = arith.constant dense<0.000000e+00> : vector<8x33xf32>
    %2 = tpu.matmul %0, %1, %cst {dimension_numbers = #tpu.dot_dimension_numbers<[1], [0], [0], [1], [0, 0, 1, 1], [], []>} : vector<8x32xf32>, vector<32x33xf32>, vector<8x33xf32> -> vector<8x33xf32>
    %3 = vector.extract_strided_slice %2 {offsets = [0, 0], sizes = [8, 32], strides = [1, 1]} : vector<8x33xf32> to vector<8x32xf32>
    %4 = vector.extract_strided_slice %2 {offsets = [0, 32], sizes = [8, 1], strides = [1, 1]} : vector<8x33xf32> to vector<8x1xf32>
    %5 = arith.mulf %3, %0 : vector<8x32xf32>
    %cst_3 = arith.constant 1.000000e+00 : f32
    %6 = vector.broadcast %cst_3 : f32 to vector<32x1xf32>
    %cst_4 = arith.constant dense<0.000000e+00> : vector<8x1xf32>
    %7 = tpu.matmul %5, %6, %cst_4 {dimension_numbers = #tpu.dot_dimension_numbers<[1], [0], [0], [1], [0, 0, 1, 1], [], []>} : vector<8x32xf32>, vector<32x1xf32>, vector<8x1xf32> -> vector<8x1xf32>
    %cst_5 = arith.constant 0.000000e+00 : f32
    %8 = vector.broadcast %cst_5 : f32 to vector<8x1xf32>
    %9 = arith.maximumf %7, %8 : vector<8x1xf32>
    %10 = math.sqrt %9 : vector<8x1xf32>
    %c0_6 = arith.constant 0 : index
    %11 = memref.load %arg3[%c0_6] : memref<1xf32, #tpu.memory_space<smem>>
    %12 = vector.broadcast %11 : f32 to vector<8x1xf32>
    %13 = arith.addf %4, %12 : vector<8x1xf32>
    %14 = tpu.concatenate %13, %10 in 1 : vector<8x1xf32>, vector<8x1xf32> -> vector<8x2xf32>
    %c0_7 = arith.constant 0 : index
    %c0_8 = arith.constant 0 : index
    %15 = vector.load %arg4[%c0_7, %c0_8] : memref<8x2xf32, #tpu.memory_space<vmem>>, vector<8x2xf32>
    tpu.vector_store %arg4[%c0_7, %c0_8], %14 {strides = array<i32>} : memref<8x2xf32, #tpu.memory_space<vmem>>, vector<8x2xf32>,
    return
  }
  func.func @transform_0(%arg0: i32) -> (i32, i32) {
    %c0_i32 = arith.constant 0 : i32
    %c0_i32_0 = arith.constant 0 : i32
    return %arg0, %c0_i32 : i32, i32
  }
  func.func @transform_1(%arg0: i32) -> (i32, i32) {
    %c0_i32 = arith.constant 0 : i32
    %c0_i32_0 = arith.constant 0 : i32
    %c0_i32_1 = arith.constant 0 : i32
    return %c0_i32, %c0_i32_0 : i32, i32
  }
  func.func @transform_2(%arg0: i32) -> i32 {
    %c0_i32 = arith.constant 0 : i32
    %c0_i32_0 = arith.constant 0 : i32
    return %c0_i32 : i32
  }
  func.func @transform_3(%arg0: i32) -> (i32, i32) {
    %c0_i32 = arith.constant 0 : i32
    %c0_i32_0 = arith.constant 0 : i32
    return %arg0, %c0_i32 : i32, i32
  }
}

</mosaic_0001>

<bundles_post_ra>
// kernel: tpu_custom_call.1
= control target key start
LH: loop header
LB: loop body
LE: loop exit
PB: predicated region body
PF: predicated region fallthrough
CT: control target
= control target key end

     0   :  { %s804_s0 = inlined_call_operand.hbm [shape: f32[16,32], index: 0, kind: input, shape index: {}]   ;;  %s805_s1 = inlined_call_operand.hbm [shape: f32[32,33], index: 1, kind: input, shape index: {}]   ;;  %s806_s2 = inlined_call_operand.<no memory space> [shape: f32[1], index: 2, kind: input, shape index: {}]   ;;  %s807_s3 = inlined_call_operand.vmem [shape: f32[16,2], index: 3, kind: output, shape index: {}]  }
   0x1   :  { %8 = sst [smem:[#allocation2]] %s806_s2 }
   0x2   :  { %9 = vsyncpa [#allocation4], 0 }
   0x3   :  { %11 = vsyncpa [#allocation4 + $0x1], 0 }
   0x4   :  { %12 = vsyncpa [#allocation6], 0  ;;  %s684_s14 = smov 0   ;;  %s686_s15 = smov 0  }
   0x5   :  { %s688_s16 = smov 0   ;;  %s690_s17 = smov 0  }
   0x6 LB: > { %s703_s2 = sadd.s32 4294967295, %s650_s17   ;;  %p38_p0 = scmp.ne.s32.totalorder %s642_s15, %s638_s14  ;;  %s650_s17 = sphi %s690_s17, %s822_s17   ;;  %s646_s16 = sphi %s688_s16, %s821_s16   ;;  %s642_s15 = sphi %s686_s15, %s820_s15   ;;  %s638_s14 = sphi %s684_s14, %s819_s14  }
   0x7   : > { %p808_p1 = scmp.eq.s32.totalorder %s703_s2, 0  ;;  %p454_p2 = scmp.ge.s32.totalorder %s650_s17, 1 }
   0x8   : > { %p117_p3 = scmp.lt.s32.totalorder %s650_s17, 3  ;;  %s652_s20 = smov [#allocation5]  }
   0x9   : > { %p711_p4 = por %p808_p1, %p38_p0  ;;  %s129_s21 = sshll.u32 %s652_s20, 4  ;;  %s130_s21 = int_to_ptr.vmem [resolvable:$true] %s129_s21 }
   0xa   : > { %p715_p5 = pnand %p454_p2, %p117_p3  ;;  %s728_s23 = sadd.s32 1, %s650_s17  }
   0xb   : > { %s811_s18 = scalar_select %p711_p4, 1, 0 }
   0xc   : > { %s812_s19 = scalar_select %p715_p5, 1, 0 }
   0xd   : > { %p505_p6 = pneg %p715_p5  ;;  %s25_s24 = sadd.s32 1, %s646_s16 }
   0xe   : > { %s22_s25 = ssub.s32 %s650_s17, %s728_s23  ;;  %s569_s26 = scalar_lea.vmem %s130_s21, 512 }
   0xf   : > { %p723_p7 = pnand %p505_p6, %p808_p1  ;;  %p570_p9 = scmp.ne.s32.totalorder %s130_s21, %s569_s26 }
  0x10   : > { %p577_p12 = scmp.lt.s32.totalorder %s130_s21, %s130_s21  ;;  %p578_p13 = scmp.lt.s32.totalorder %s569_s26, %s569_s26 }
  0x11   : > { %p560_p8 = pneg %p723_p7 }
  0x12   : > { %p579_p0 = por %p578_p13, %p577_p12 }
  0x13   : > { %p572_p10 = pnand %p570_p9, %p560_p8 }
  0x15   : > { %p573_p11 = pneg %p572_p10 }
  0x17   : > { %p580_p2 = pnand %p579_p0, %p573_p11 }
  0x19   : > { %583 = shalt.err (!%p580_p2)
}
  0x1a   : > { %s653_s27 = smov 128   ;;  %s654_s28 = smov 8  }
  0x1b   : > { %508 = dma.hbm_to_vmem [thread:$0]  (!%p723_p7), %s805_s1, 512, %s130_s21, [#allocation6], %s653_s27, %s653_s27, %s654_s28  }
  0x1c   : > { %p23_p3 = scmp.eq.s32.totalorder %s22_s25, 0  ;;  %p32_p6 = scmp.ne.s32.totalorder %s646_s16, %s642_s15 }
  0x1d   : > { %p33_p8 = scmp.eq.s32.totalorder %s650_s17, 0  ;;  %p514_p9 = scmp.lt.s32.totalorder %s650_s17, 2 }
  0x1e   : > { %s745_s4 = scalar_select %p23_p3, %s646_s16, %s25_s24  }
  0x1f   : > { %p34_p10 = por %p33_p8, %p32_p6  ;;  %s146_s5 = sand.u32 1, %s646_s16  }
  0x20   : > { %s457_s6 = sshll.u32 %s146_s5, 3  ;;  %s458_s7 = sshll.u32 %s650_s17, 7 }
  0x21   : > { %s752_s10 = scalar_lea.hbm %s804_s0, %s458_s7  ;;  %s150_s11 = scalar_lea.vmem [#allocation3], %s457_s6 }
  0x22   : > { %s157_s12 = sshll.u32 %s150_s11, 4  ;;  %p754_p7 = pnand %p514_p9, %p34_p10  ;;  %s158_s12 = int_to_ptr.vmem [resolvable:$true] %s157_s12 }
  0x23   : > { %s147_s14 = scalar_lea.sflag [#allocation4], %s146_s5  ;;  %s584_s20 = scalar_lea.hbm %s752_s10, 128 }
  0x24   : > { %p585_p11 = scmp.ne.s32.totalorder %s752_s10, %s584_s20  ;;  %p586_p12 = pneg %p754_p7 }
  0x25   : > { %s589_s22 = scalar_lea.hbm %s804_s0, 256  ;;  %p590_p2 = scmp.lt.s32.totalorder %s752_s10, %s804_s0 }
  0x26   : > { %p587_p13 = pnand %p586_p12, %p585_p11  ;;  %p591_p3 = scmp.lt.s32.totalorder %s589_s22, %s584_s20 }
  0x28   : > { %p588_p0 = pneg %p587_p13  ;;  %p592_p6 = por %p591_p3, %p590_p2 }
  0x2a   : > { %p593_p8 = pnand %p592_p6, %p588_p0 }
  0x2c   : > { %596 = shalt.err (!%p593_p8)
}
  0x2d   : > { %s597_s26 = scalar_lea.vmem %s158_s12, 128  ;;  %s655_s27 = smov [#allocation3]  }
  0x2e   : > { %p598_p9 = scmp.ne.s32.totalorder %s158_s12, %s597_s26  ;;  %s602_s28 = sshll.u32 %s655_s27, 4  ;;  %s603_s28 = int_to_ptr.vmem [resolvable:$false] %s602_s28 }
  0x2f   : > { %s604_s29 = scalar_lea.vmem %s603_s28, 256  ;;  %p605_p11 = scmp.lt.s32.totalorder %s158_s12, %s603_s28 }
  0x30   : > { %p600_p10 = pnand %p598_p9, %p586_p12  ;;  %p606_p13 = scmp.lt.s32.totalorder %s604_s29, %s597_s26 }
  0x32   : > { %p601_p1 = pneg %p600_p10  ;;  %p607_p4 = por %p606_p13, %p605_p11 }
  0x34   : > { %p608_p5 = pnand %p607_p4, %p601_p1 }
  0x36   : > { %611 = shalt.err (!%p608_p5)
}
  0x37   : > { %512 = dma.hbm_to_vmem [thread:$0]  (!%p754_p7), %s752_s10, 128, %s158_s12, %s147_s14  }
  0x38   : > { %p815_p0 = scmp.ne.s32.totalorder %s812_s19, 0 }
  0x39   : > { %s168_s30 = sand.u32 (!%p815_p0), 1, %s642_s15   ;;  %p816_p12 = scmp.ne.s32.totalorder (!%p815_p0), %s811_s18, 0 }
  0x3a   : > { %166 = sbr.rel (%p815_p0) target bundleno = 602 (0x25a), region = 32  ;;  %s775_s5 = sshll.u32 (!%p815_p0), %s168_s30, 3 }
  0x3b   : > { %s169_s6 = scalar_lea.sflag (!%p815_p0), [#allocation4], %s168_s30  ;;  %s172_s7 = scalar_lea.vmem (!%p815_p0), [#allocation3], %s775_s5 }
  0x3f   : > { %629 = dma.done.wait (%p816_p12), %s169_s6, 128  }
  0x40   : > { %631 = vsyncadd (%p816_p12), %s169_s6, 4294967168  ;;  %p817_p1 = scmp.eq.s32.totalorder %s703_s2, 0 }
  0x42   : > { %633 = dma.done.wait (%p817_p1), [#allocation6], 512   ;;  %p818_p4 = pmov %p817_p1 }
  0x43   : > { %v656_v0 = vmov 0.0   ;;  %vm657_vm0 = vmmov 0   ;;  %v658_v1 = vmov 1.0   ;;  %v206_v2 = vld [vmem:[#allocation5 + $0x18] sm:$0xff]  ;;  %v205_v3 = vld [vmem:[#allocation5 + $0x10] sm:$0xff]  ;;  %v204_v4 = vld [vmem:[#allocation5 + $0x8] sm:$0xff] }
  0x44   : > { %635 = vsyncadd (%p818_p4), [#allocation6], 4294966784  ;;  %477 = vmatprep.subr.mxu0 %v656_v0  ;;  %485 = vmatprep.mubr.msk.f32.mxu0 %vm657_vm0, %v656_v0  ;;  %v203_v5 = vld [vmem:[#allocation5] sm:$0xff]  ;;  %v202_v6 = vld [vmem:[%s172_s7] sm:$0xff]  ;;  %vm207_vm1 = vcmask 261120   ;;  %s363_s18 = sld [smem:[#allocation2]] }
  0x45   : > { %488 = vmatprep.subr.mxu1 %v656_v0  ;;  %496 = vmatprep.mubr.msk.f32.mxu1 %vm657_vm0, %v656_v0  ;;  %s659_s19 = smov 96   ;;  %s660_s8 = smov 1   ;;  %vm374_vm4 = vcmask 7168   ;;  %vm376_vm5 = vcmask 15360  }
  0x46   : > { %489 = vmatpush3.msra.mxu1 %v658_v1  ;;  %478 = vmatpush3.msra.mxu0 %v206_v2  ;;  %p198_p5 = scmp.lt.s32.totalorder %s703_s2, 1 }
  0x47   : > { %490 = vmatprep.subr.mxu1 %v656_v0  ;;  %479 = vmatprep.subr.mxu0 %v656_v0 }
  0x48   : > { %491 = vmatpush3.msra.mxu1 %v658_v1  ;;  %480 = vmatpush3.msra.mxu0 %v205_v3  ;;  %s824_s2 = smov (!%p198_p5, %s703_s2), 1 }
  0x49   : > { %492 = vmatprep.subr.mxu1 %v656_v0  ;;  %481 = vmatprep.subr.mxu0 %v656_v0  ;;  %s462_s9 = sshll.u32 %s824_s2, 3 }
  0x4a   : > { %493 = vmatpush3.msra.mxu1 %v658_v1  ;;  %482 = vmatpush3.msra.mxu0 %v204_v4  ;;  %v364_v7 = vstv %s363_s18  ;;  %s201_s12 = scalar_lea.vmem %s807_s3, %s462_s9 }
  0x4b   : > { %494 = vmatprep.subr.mxu1 %v656_v0  ;;  %483 = vmatprep.subr.mxu0 %v656_v0 }
  0x4c   : > { %495 = vmatpush3.msra.mxu1 %v658_v1  ;;  %484 = vmatpush3.msra.mxu0 %v203_v5 }
  0x4d   : > { %486 = vmatmul.mubr.msk.f32.vlgmr.msra.gmra.mxu0 %vm207_vm1, %v202_v6 }
 0x10d   : > { %v277_v8 = vpop.f32.mrf.mxu0 }
 0x10e   : > { %v281_v9 = vmul.f32 %v277_v8, %v202_v6  ;;  %v365_v10 = vadd.f32 %v364_v7, %v277_v8 }
 0x10f   : > { %v487_v11 = vpop.f32.mrf.mxu0 }
 0x110   : > { %367 = vrot.lane.b32.xlu0 %v365_v10, %s659_s19  ;;  %497 = vmatmul.mubr.msk.f32.vlgmr.msra.gmra.mxu1 %vm207_vm1, %v281_v9 }
 0x182   : > { %v368_v20 = vpop.permute.xlu0 %367 }
 0x1d0   : > { %v351_v12 = vpop.f32.mrf.mxu1 }
 0x1d1   : > { %v355_v13 = vmax.f32 %v351_v12, 0.0 }
 0x1d2   : > { %v498_v14 = vpop.f32.mrf.mxu1 }
 0x1d3   : > { %556 = vrsqrt.f32 %v355_v13  ;;  %vm358_vm2 = vcmp.eq.f32.partialorder %v355_v13, inf  ;;  %v361_v17 = vand.u32 2147483648, %v355_v13  ;;  %vm360_vm3 = vcmp.eq.f32.partialorder %v355_v13, 0.0 }
 0x1e0   : > { %v557_v15 = vpop.eup %556 }
 0x1e1   : > { %v357_v16 = vmul.f32 %v557_v15, %v355_v13 }
 0x1e3   : > { %v359_v18 = vsel %vm358_vm2, %v355_v13, %v357_v16 }
 0x1e4   : > { %v362_v19 = vsel %vm360_vm3, %v361_v17, %v359_v18 }
 0x1e5   : > { %371 = vrot.lane.b32.xlu0 %v362_v19, %s660_s8 }
 0x257   : > { %v372_v21 = vpop.permute.xlu0 %371 }
 0x258   : > { %v375_v22 = vsel %vm374_vm4, %v368_v20, %v372_v21 }
 0x259   : > { %377 = vst.msk [vmem:[%s201_s12] sm:$0xff] %vm376_vm5, %v375_v22 }
 0x25a PF: > { %p15_p7 = scmp.ge.s32.totalorder %s728_s23, 4   ;;  %s819_s14 = smov %s642_s15 }
 0x25b   : > { %s820_s15 = smov %s646_s16  ;;  %s821_s16 = smov %s745_s4 }
 0x25c   : > { %s822_s17 = smov %s728_s23  ;;  %17 = sbr.rel (!%p15_p7) target bundleno = 6 (0x6), region = 76 }
 0x261   :  { %397 = vsyncpa [#allocation4], 1 }
 0x262   :  { %399 = vsyncpa [#allocation4 + $0x1], 1 }
 0x263   :  { %400 = vsyncpa [#allocation6], 1 }

</bundles_post_ra>
